<compile_context>
chip_gen: v5e
topology: v5e:2x2
jax: 0.10.0
libtpu: 0.0.40
codegen_flags: <defaults>
</compile_context>

<pallas_src>
import jax
import jax.numpy as jnp
from jax.experimental import pallas as pl
from jax.experimental.pallas import tpu as pltpu


def _round_up(x, m):
    return (x + m - 1) // m * m


def _generator_mlp_kernel(x_ref,
                          w1_ref, b1_ref,
                          w2_ref, b2_ref,
                          w3_ref, b3_ref,
                          w4_ref, b4_ref,
                          out_ref):
    """relu(X@W1f + b1) -> relu(.W2+b2) -> relu(.W3+b3) -> tanh(.W4+b4).

    X = [z | onehot(labels)] (bf16), W1f = [W1[:noise_dim] ; emb@W1[noise_dim:]].
    All MXU dots take bf16 inputs with f32 accumulation; bias/ReLU/tanh in f32.
    """
    h = jnp.dot(x_ref[...], w1_ref[...], preferred_element_type=jnp.float32)
    h = jnp.maximum(h + b1_ref[...], 0.0)

    h = jnp.dot(h.astype(jnp.bfloat16), w2_ref[...],
                preferred_element_type=jnp.float32)
    h = jnp.maximum(h + b2_ref[...], 0.0)

    h = jnp.dot(h.astype(jnp.bfloat16), w3_ref[...],
                preferred_element_type=jnp.float32)
    h = jnp.maximum(h + b3_ref[...], 0.0)

    h = jnp.dot(h.astype(jnp.bfloat16), w4_ref[...],
                preferred_element_type=jnp.float32)
    out_ref[...] = jnp.tanh(h + b4_ref[...]).astype(out_ref.dtype)


def init_params(key, noise_dim, latent_dim, num_classes, output_dim):
    """Torch-like f32 params. Weights stored as (in, out) so y = x @ W + b."""
    dims = [(noise_dim + latent_dim, 128), (128, 256), (256, 512), (512, output_dim)]
    keys = jax.random.split(key, 2 * len(dims) + 1)
    params = {}
    for i, (din, dout) in enumerate(dims):
        bound = 1.0 / jnp.sqrt(din)
        params[f"w{i+1}"] = jax.random.uniform(
            keys[2 * i], (din, dout), jnp.float32, -bound, bound)
        params[f"b{i+1}"] = jax.random.uniform(
            keys[2 * i + 1], (1, dout), jnp.float32, -bound, bound)
    # nn.Embedding default: N(0, 1)
    params["emb"] = jax.random.normal(keys[-1], (num_classes, latent_dim), jnp.float32)
    return params


def prepare_kernel_params(params, noise_dim):
    """One-time conversion of torch-like params into kernel-friendly layout."""
    out_dim = params["w4"].shape[1]
    n_pad = _round_up(out_dim, 128)                  # lane-dense output stores
    num_classes = params["emb"].shape[0]
    n_cls_pad = _round_up(num_classes, 16)           # bf16 sublane packing

    # Fold embedding lookup + concat + layer-1 split into ONE weight:
    #   h1 = [z | onehot(lbl)] @ [W1[:noise_dim] ; emb@W1[noise_dim:]] + b1
    t = params["emb"] @ params["w1"][noise_dim:, :]  # (num_classes, 128) f32
    t = jnp.pad(t, ((0, n_cls_pad - num_classes), (0, 0)))
    w1_fused = jnp.concatenate([params["w1"][:noise_dim, :], t], axis=0)

    w4 = jnp.pad(params["w4"], ((0, 0), (0, n_pad - out_dim)))
    b4 = jnp.pad(params["b4"], ((0, 0), (0, n_pad - out_dim)))

    return {
        "w1": w1_fused.astype(jnp.bfloat16),
        "b1": params["b1"],
        "w2": params["w2"].astype(jnp.bfloat16),
        "b2": params["b2"],
        "w3": params["w3"].astype(jnp.bfloat16),
        "b3": params["b3"],
        "w4": w4.astype(jnp.bfloat16),
        "b4": b4,
        "noise_dim": noise_dim,
        "n_cls_pad": n_cls_pad,
        "out_dim": out_dim,
    }


def generator_forward(z, labels, kp):
    """z: [B, noise_dim] f32, labels: [B] int. Returns [B, output_dim] f32."""
    B, noise_dim = z.shape
    assert noise_dim == kp["noise_dim"]
    n_cls_pad = kp["n_cls_pad"]
    out_dim = kp["out_dim"]
    n_pad = kp["w4"].shape[1]
    k1 = noise_dim + n_cls_pad

    # Fused layer-1 input, built once in the wrapper (bf16 halves input DMA).
    onehot = jax.nn.one_hot(labels, n_cls_pad, dtype=jnp.bfloat16)
    x = jnp.concatenate([z.astype(jnp.bfloat16), onehot], axis=1)   # (B, k1)

    # Batch tiling: 16-row alignment (bf16 sublanes) for small B; for B>=256
    # split into >=2 grid steps so v7x's second TensorCore gets work, capped
    # at 1024 rows/tile (footprint stays far under every chip's VMEM limit).
    if B >= 256:
        tile_m = min(1024, _round_up(pl.cdiv(B, 2), 16))
    else:
        tile_m = _round_up(B, 16)
    b_pad = _round_up(B, tile_m)
    if b_pad != B:
        x = jnp.pad(x, ((0, b_pad - B), (0, 0)))     # padded rows sliced off below
    n_tiles = b_pad // tile_m

    const = lambda shape: pl.BlockSpec(shape, lambda i: tuple(0 for _ in shape))
    rows = lambda shape: pl.BlockSpec(shape, lambda i: (i, 0))

    weights = (kp["w1"], kp["b1"], kp["w2"], kp["b2"],
               kp["w3"], kp["b3"], kp["w4"], kp["b4"])

    flops = 2 * b_pad * (k1 * 128 + 128 * 256 + 256 * 512 + 512 * n_pad)
    # Per-call traffic: activations in/out + one pass over resident weights.
    bytes_accessed = (int(x.size) * x.dtype.itemsize
                      + b_pad * n_pad * 2
                      + sum(int(w.size) * w.dtype.itemsize for w in weights))
    cost = pl.CostEstimate(flops=flops, transcendentals=b_pad * n_pad,
                           bytes_accessed=bytes_accessed)

    out_padded = pl.pallas_call(
        _generator_mlp_kernel,
        out_shape=jax.ShapeDtypeStruct((b_pad, n_pad), jnp.bfloat16),
        grid=(n_tiles,),
        in_specs=[rows((tile_m, k1))] + [const(w.shape) for w in weights],
        out_specs=rows((tile_m, n_pad)),
        compiler_params=pltpu.CompilerParams(
            dimension_semantics=("parallel",),
            vmem_limit_bytes=32 * 1024 * 1024),
        cost_estimate=cost,
    )(x, *weights)

    return out_padded[:B, :out_dim].astype(jnp.float32)


def reference_forward(z, labels, params):
    """Pure-JAX f32 reference mirroring the PyTorch forward."""
    x = jnp.concatenate([z, jnp.take(params["emb"], labels, axis=0)], axis=1)
    x = jnp.maximum(x @ params["w1"] + params["b1"], 0.0)
    x = jnp.maximum(x @ params["w2"] + params["b2"], 0.0)
    x = jnp.maximum(x @ params["w3"] + params["b3"], 0.0)
    return jnp.tanh(x @ params["w4"] + params["b4"])


if __name__ == "__main__":
    noise_dim, latent_dim, num_classes, output_dim = 16, 16, 10, 64
    batch = 8

    key = jax.random.PRNGKey(0)
    k_params, k_z, k_lbl = jax.random.split(key, 3)

    params = init_params(k_params, noise_dim, latent_dim, num_classes, output_dim)
    kparams = prepare_kernel_params(params, noise_dim)

    z = jax.random.normal(k_z, (batch, noise_dim), jnp.float32)
    labels = jax.random.randint(k_lbl, (batch,), 0, num_classes, jnp.int32)

    out = jax.block_until_ready(generator_forward(z, labels, kparams))
    ref = jax.block_until_ready(reference_forward(z, labels, params))

    assert out.shape == (batch, output_dim)
    # bf16 MXU inputs + bf16 output store -> relaxed tolerance vs f32 reference.
    assert jnp.allclose(out, ref, atol=4e-2, rtol=4e-2), "mismatch vs reference"

    print("KERNEL_OK")
</pallas_src>

<mosaic_0001>
module attributes {stable_mosaic.version = 11 : i64} {
  func.func @_generator_mlp_kernel(%arg0: i32, %arg1: memref<16x32xbf16, #tpu.memory_space<vmem>>, %arg2: memref<32x128xbf16, #tpu.memory_space<vmem>>, %arg3: memref<1x128xf32, #tpu.memory_space<vmem>>, %arg4: memref<128x256xbf16, #tpu.memory_space<vmem>>, %arg5: memref<1x256xf32, #tpu.memory_space<vmem>>, %arg6: memref<256x512xbf16, #tpu.memory_space<vmem>>, %arg7: memref<1x512xf32, #tpu.memory_space<vmem>>, %arg8: memref<512x128xbf16, #tpu.memory_space<vmem>>, %arg9: memref<1x128xf32, #tpu.memory_space<vmem>>, %arg10: memref<16x128xbf16, #tpu.memory_space<vmem>>) attributes {dimension_semantics = [#tpu.dimension_semantics<parallel>], iteration_bounds = array<i64: 1>, scalar_prefetch = 0 : i64, scratch_operands = 0 : i64, tpu.core_type = #tpu.core_type<tc>, window_params = [{transform_indices = @transform_0, window_bounds = array<i64: 16, 32>}, {pipeline_mode = #tpu.pipeline_mode<synchronous>, transform_indices = @transform_1, window_bounds = array<i64: 32, 128>}, {pipeline_mode = #tpu.pipeline_mode<synchronous>, transform_indices = @transform_2, window_bounds = array<i64: 1, 128>}, {pipeline_mode = #tpu.pipeline_mode<synchronous>, transform_indices = @transform_3, window_bounds = array<i64: 128, 256>}, {pipeline_mode = #tpu.pipeline_mode<synchronous>, transform_indices = @transform_4, window_bounds = array<i64: 1, 256>}, {pipeline_mode = #tpu.pipeline_mode<synchronous>, transform_indices = @transform_5, window_bounds = array<i64: 256, 512>}, {pipeline_mode = #tpu.pipeline_mode<synchronous>, transform_indices = @transform_6, window_bounds = array<i64: 1, 512>}, {pipeline_mode = #tpu.pipeline_mode<synchronous>, transform_indices = @transform_7, window_bounds = array<i64: 512, 128>}, {pipeline_mode = #tpu.pipeline_mode<synchronous>, transform_indices = @transform_8, window_bounds = array<i64: 1, 128>}, {transform_indices = @transform_9, window_bounds = array<i64: 16, 128>}]} {
    %c0 = arith.constant 0 : index
    %c0_0 = arith.constant 0 : index
    %0 = vector.load %arg1[%c0, %c0_0] : memref<16x32xbf16, #tpu.memory_space<vmem>>, vector<16x32xbf16>
    %c0_1 = arith.constant 0 : index
    %c0_2 = arith.constant 0 : index
    %1 = vector.load %arg2[%c0_1, %c0_2] : memref<32x128xbf16, #tpu.memory_space<vmem>>, vector<32x128xbf16>
    %cst = arith.constant dense<0.000000e+00> : vector<16x128xf32>
    %2 = tpu.matmul %0, %1, %cst {dimension_numbers = #tpu.dot_dimension_numbers<[1], [0], [0], [1], [0, 0, 1, 1], [], []>} : vector<16x32xbf16>, vector<32x128xbf16>, vector<16x128xf32> -> vector<16x128xf32>
    %c0_3 = arith.constant 0 : index
    %c0_4 = arith.constant 0 : index
    %3 = vector.load %arg3[%c0_3, %c0_4] : memref<1x128xf32, #tpu.memory_space<vmem>>, vector<1x128xf32>
    %4 = vector.broadcast %3 : vector<1x128xf32> to vector<16x128xf32>
    %5 = arith.addf %2, %4 : vector<16x128xf32>
    %cst_5 = arith.constant 0.000000e+00 : f32
    %6 = vector.broadcast %cst_5 : f32 to vector<16x128xf32>
    %7 = arith.maximumf %5, %6 : vector<16x128xf32>
    %8 = arith.truncf %7 : vector<16x128xf32> to vector<16x128xbf16>
    %c0_6 = arith.constant 0 : index
    %c0_7 = arith.constant 0 : index
    %9 = vector.load %arg4[%c0_6, %c0_7] : memref<128x256xbf16, #tpu.memory_space<vmem>>, vector<128x256xbf16>
    %cst_8 = arith.constant dense<0.000000e+00> : vector<16x256xf32>
    %10 = tpu.matmul %8, %9, %cst_8 {dimension_numbers = #tpu.dot_dimension_numbers<[1], [0], [0], [1], [0, 0, 1, 1], [], []>} : vector<16x128xbf16>, vector<128x256xbf16>, vector<16x256xf32> -> vector<16x256xf32>
    %c0_9 = arith.constant 0 : index
    %c0_10 = arith.constant 0 : index
    %11 = vector.load %arg5[%c0_9, %c0_10] : memref<1x256xf32, #tpu.memory_space<vmem>>, vector<1x256xf32>
    %12 = vector.broadcast %11 : vector<1x256xf32> to vector<16x256xf32>
    %13 = arith.addf %10, %12 : vector<16x256xf32>
    %cst_11 = arith.constant 0.000000e+00 : f32
    %14 = vector.broadcast %cst_11 : f32 to vector<16x256xf32>
    %15 = arith.maximumf %13, %14 : vector<16x256xf32>
    %16 = arith.truncf %15 : vector<16x256xf32> to vector<16x256xbf16>
    %c0_12 = arith.constant 0 : index
    %c0_13 = arith.constant 0 : index
    %17 = vector.load %arg6[%c0_12, %c0_13] : memref<256x512xbf16, #tpu.memory_space<vmem>>, vector<256x512xbf16>
    %cst_14 = arith.constant dense<0.000000e+00> : vector<16x512xf32>
    %18 = tpu.matmul %16, %17, %cst_14 {dimension_numbers = #tpu.dot_dimension_numbers<[1], [0], [0], [1], [0, 0, 1, 1], [], []>} : vector<16x256xbf16>, vector<256x512xbf16>, vector<16x512xf32> -> vector<16x512xf32>
    %c0_15 = arith.constant 0 : index
    %c0_16 = arith.constant 0 : index
    %19 = vector.load %arg7[%c0_15, %c0_16] : memref<1x512xf32, #tpu.memory_space<vmem>>, vector<1x512xf32>
    %20 = vector.broadcast %19 : vector<1x512xf32> to vector<16x512xf32>
    %21 = arith.addf %18, %20 : vector<16x512xf32>
    %cst_17 = arith.constant 0.000000e+00 : f32
    %22 = vector.broadcast %cst_17 : f32 to vector<16x512xf32>
    %23 = arith.maximumf %21, %22 : vector<16x512xf32>
    %24 = arith.truncf %23 : vector<16x512xf32> to vector<16x512xbf16>
    %c0_18 = arith.constant 0 : index
    %c0_19 = arith.constant 0 : index
    %25 = vector.load %arg8[%c0_18, %c0_19] : memref<512x128xbf16, #tpu.memory_space<vmem>>, vector<512x128xbf16>
    %cst_20 = arith.constant dense<0.000000e+00> : vector<16x128xf32>
    %26 = tpu.matmul %24, %25, %cst_20 {dimension_numbers = #tpu.dot_dimension_numbers<[1], [0], [0], [1], [0, 0, 1, 1], [], []>} : vector<16x512xbf16>, vector<512x128xbf16>, vector<16x128xf32> -> vector<16x128xf32>
    %c0_21 = arith.constant 0 : index
    %c0_22 = arith.constant 0 : index
    %27 = vector.load %arg9[%c0_21, %c0_22] : memref<1x128xf32, #tpu.memory_space<vmem>>, vector<1x128xf32>
    %28 = vector.broadcast %27 : vector<1x128xf32> to vector<16x128xf32>
    %29 = arith.addf %26, %28 : vector<16x128xf32>
    %30 = math.tanh %29 : vector<16x128xf32>
    %31 = arith.truncf %30 : vector<16x128xf32> to vector<16x128xbf16>
    %c0_23 = arith.constant 0 : index
    %c0_24 = arith.constant 0 : index
    %32 = vector.load %arg10[%c0_23, %c0_24] : memref<16x128xbf16, #tpu.memory_space<vmem>>, vector<16x128xbf16>
    tpu.vector_store %arg10[%c0_23, %c0_24], %31 {strides = array<i32>} : memref<16x128xbf16, #tpu.memory_space<vmem>>, vector<16x128xbf16>,
    return
  }
  func.func @transform_0(%arg0: i32) -> (i32, i32) {
    %c0_i32 = arith.constant 0 : i32
    %c0_i32_0 = arith.constant 0 : i32
    return %arg0, %c0_i32 : i32, i32
  }
  func.func @transform_1(%arg0: i32) -> (i32, i32) {
    %c0_i32 = arith.constant 0 : i32
    %c0_i32_0 = arith.constant 0 : i32
    %c0_i32_1 = arith.constant 0 : i32
    return %c0_i32, %c0_i32_0 : i32, i32
  }
  func.func @transform_2(%arg0: i32) -> (i32, i32) {
    %c0_i32 = arith.constant 0 : i32
    %c0_i32_0 = arith.constant 0 : i32
    %c0_i32_1 = arith.constant 0 : i32
    return %c0_i32, %c0_i32_0 : i32, i32
  }
  func.func @transform_3(%arg0: i32) -> (i32, i32) {
    %c0_i32 = arith.constant 0 : i32
    %c0_i32_0 = arith.constant 0 : i32
    %c0_i32_1 = arith.constant 0 : i32
    return %c0_i32, %c0_i32_0 : i32, i32
  }
  func.func @transform_4(%arg0: i32) -> (i32, i32) {
    %c0_i32 = arith.constant 0 : i32
    %c0_i32_0 = arith.constant 0 : i32
    %c0_i32_1 = arith.constant 0 : i32
    return %c0_i32, %c0_i32_0 : i32, i32
  }
  func.func @transform_5(%arg0: i32) -> (i32, i32) {
    %c0_i32 = arith.constant 0 : i32
    %c0_i32_0 = arith.constant 0 : i32
    %c0_i32_1 = arith.constant 0 : i32
    return %c0_i32, %c0_i32_0 : i32, i32
  }
  func.func @transform_6(%arg0: i32) -> (i32, i32) {
    %c0_i32 = arith.constant 0 : i32
    %c0_i32_0 = arith.constant 0 : i32
    %c0_i32_1 = arith.constant 0 : i32
    return %c0_i32, %c0_i32_0 : i32, i32
  }
  func.func @transform_7(%arg0: i32) -> (i32, i32) {
    %c0_i32 = arith.constant 0 : i32
    %c0_i32_0 = arith.constant 0 : i32
    %c0_i32_1 = arith.constant 0 : i32
    return %c0_i32, %c0_i32_0 : i32, i32
  }
  func.func @transform_8(%arg0: i32) -> (i32, i32) {
    %c0_i32 = arith.constant 0 : i32
    %c0_i32_0 = arith.constant 0 : i32
    %c0_i32_1 = arith.constant 0 : i32
    return %c0_i32, %c0_i32_0 : i32, i32
  }
  func.func @transform_9(%arg0: i32) -> (i32, i32) {
    %c0_i32 = arith.constant 0 : i32
    %c0_i32_0 = arith.constant 0 : i32
    return %arg0, %c0_i32 : i32, i32
  }
}

</mosaic_0001>

<bundles_post_ra>
// kernel: tpu_custom_call.1
= control target key start
LH: loop header
LB: loop body
LE: loop exit
PB: predicated region body
PF: predicated region fallthrough
CT: control target
= control target key end

     0   :  { %14 = vsyncpa [#allocation3], 0  ;;  %s2055_s0 = inlined_call_operand.hbm [shape: bf16[16,32], index: 0, kind: input, shape index: {}]   ;;  %s2056_s1 = inlined_call_operand.hbm [shape: bf16[32,128], index: 1, kind: input, shape index: {}]   ;;  %s2057_s2 = inlined_call_operand.vmem [shape: f32[1,128], index: 2, kind: input, shape index: {}]   ;;  %s2058_s3 = inlined_call_operand.hbm [shape: bf16[128,256], index: 3, kind: input, shape index: {}]   ;;  %s2059_s4 = inlined_call_operand.hbm [shape: f32[1,256], index: 4, kind: input, shape index: {}]   ;;  %s2060_s5 = inlined_call_operand.hbm [shape: bf16[256,512], index: 5, kind: input, shape index: {}]   ;;  %s2061_s6 = inlined_call_operand.vmem [shape: f32[1,512], index: 6, kind: input, shape index: {}]   ;;  %s2062_s7 = inlined_call_operand.hbm [shape: bf16[512,128], index: 7, kind: input, shape index: {}]   ;;  %s2063_s8 = inlined_call_operand.vmem [shape: f32[1,128], index: 8, kind: input, shape index: {}]   ;;  %s2064_s9 = inlined_call_operand.hbm [shape: bf16[16,128], index: 9, kind: output, shape index: {}]  }
   0x1   :  { %15 = vsyncpa [#allocation6], 0 }
   0x2   :  { %16 = vsyncpa [#allocation9], 0 }
   0x3   :  { %17 = vsyncpa [#allocation12], 0 }
   0x4   :  { %18 = vsyncpa [#allocation4], 0  ;;  %s36_s11 = sshll.u32 %s2056_s1, 4  ;;  %s1950_s12 = smov [#allocation5]   ;;  %s37_s11 = int_to_ptr.hbm [resolvable:$true] %s36_s11 }
   0x5   :  { %s38_s13 = sshll.u32 %s1950_s12, 4  ;;  %s65_s16 = sshll.u32 %s2059_s4, 4  ;;  %s39_s13 = int_to_ptr.vmem [resolvable:$true] %s38_s13  ;;  %s66_s16 = int_to_ptr.hbm [resolvable:$true] %s65_s16 }
   0x6   :  { %s1951_s17 = smov 64   ;;  %s1952_s18 = smov 4  }
   0x7   :  { %44 = dma.hbm_to_vmem [thread:$0]  %s37_s11, 256, %s39_s13, [#allocation6], %s1951_s17, %s1951_s17, %s1952_s18  }
   0x8   :  { %s1953_s19 = smov [#allocation8]   ;;  %s23_s1 = sshll.u32 %s2055_s0, 4  ;;  %s24_s1 = int_to_ptr.hbm [resolvable:$true] %s23_s1 }
   0x9   :  { %s67_s20 = sshll.u32 %s1953_s19, 4  ;;  %s51_s4 = sshll.u32 %s2058_s3, 4  ;;  %s68_s20 = int_to_ptr.vmem [resolvable:$true] %s67_s20  ;;  %s52_s4 = int_to_ptr.hbm [resolvable:$true] %s51_s4 }
   0xa   :  { %70 = dma.hbm_to_vmem [thread:$0]  %s66_s16, 32, %s68_s20, [#allocation9]  }
   0xb   :  { %s1954_s25 = smov [#allocation2]   ;;  %s1955_s27 = smov [#allocation7]  }
   0xc   :  { %s25_s26 = sshll.u32 %s1954_s25, 4  ;;  %s53_s28 = sshll.u32 %s1955_s27, 4  ;;  %s26_s26 = int_to_ptr.vmem [resolvable:$true] %s25_s26  ;;  %s54_s28 = int_to_ptr.vmem [resolvable:$true] %s53_s28 }
   0xd   :  { %31 = dma.hbm_to_vmem [thread:$0]  %s24_s1, 128, %s26_s26, [#allocation3], %s1951_s17, %s1951_s17, %s1952_s18  }
   0xe   :  { %s1956_s29 = smov 128   ;;  %s1957_s0 = smov 8  }
   0xf   :  { %59 = dma.hbm_to_vmem [thread:$0]  %s52_s4, 2048, %s54_s28, [#allocation6], %s1956_s29, %s1956_s29, %s1957_s0  }
  0x10   :  { %s75_s11 = sshll.u32 %s2060_s5, 4  ;;  %s1958_s3 = smov [#allocation10]   ;;  %s76_s11 = int_to_ptr.hbm [resolvable:$true] %s75_s11 }
  0x11   :  { %s77_s12 = sshll.u32 %s1958_s3, 4  ;;  %s90_s15 = sshll.u32 %s2062_s7, 4  ;;  %s78_s12 = int_to_ptr.vmem [resolvable:$true] %s77_s12  ;;  %s91_s15 = int_to_ptr.hbm [resolvable:$true] %s90_s15 }
  0x12   :  { %s1959_s16 = smov 256   ;;  %s1960_s19 = smov 16  }
  0x13   :  { %83 = dma.hbm_to_vmem [thread:$0]  %s76_s11, 8192, %s78_s12, [#allocation9], %s1959_s16, %s1959_s16, %s1960_s19  }
  0x14   :  { %s1961_s20 = smov [#allocation11]  }
  0x15   :  { %s92_s21 = sshll.u32 %s1961_s20, 4  ;;  %s93_s21 = int_to_ptr.vmem [resolvable:$true] %s92_s21 }
  0x16   :  { %98 = dma.hbm_to_vmem [thread:$0]  %s91_s15, 4096, %s93_s21, [#allocation12], %s1951_s17, %s1951_s17, %s1952_s18  }
  0x17   :  { %1940 = dma.done.wait [#allocation3], 128  }
  0x18   :  { %1941 = vsyncadd [#allocation3], 4294967168 }
  0x19   :  { %1942 = dma.done.wait [#allocation6], 2304  }
  0x1a   :  { %1943 = vsyncadd [#allocation6], 4294964992 }
  0x1b   :  { %1944 = dma.done.wait [#allocation9], 8224  }
  0x1c   :  { %1945 = vsyncadd [#allocation9], 4294959072 }
  0x1d   :  { %1946 = dma.done.wait [#allocation12], 4096  }
  0x1e   :  { %1947 = vsyncadd [#allocation12], 4294963200  ;;  %v1635_v0 = vld [vmem:[#allocation5 + $0x8] sm:$0xff]  ;;  %v1634_v1 = vld [vmem:[#allocation5] sm:$0xff]  ;;  %vm153_vm0 = vcmask 261120   ;;  %s1962_s23 = smov [#allocation13]  }
  0x1f   :  { %v1243_v2 = vld [vmem:[#allocation7 + $0x70] sm:$0xf]  ;;  %v1651_v3 = vld [vmem:[#allocation7 + $0x74] sm:$0xf0]  ;;  %v1650_v4 = vld [vmem:[#allocation7 + $0x74] sm:$0xf]  ;;  %163 = vmatpush.bf16.msra.mxu0 %v1635_v0 }
  0x20   :  { %v1244_v5 = vor.u32 %v1651_v3, %v1243_v2  ;;  %v1245_v6 = vld [vmem:[#allocation7 + $0x78] sm:$0xf0]  ;;  %v1235_v7 = vld [vmem:[#allocation7 + $0x60] sm:$0xf]  ;;  %v1649_v8 = vld [vmem:[#allocation7 + $0x64] sm:$0xf0] }
  0x21   :  { %v1248_v9 = vor.u32 %v1650_v4, %v1245_v6  ;;  %v1648_v10 = vld [vmem:[#allocation7 + $0x64] sm:$0xf]  ;;  %v1237_v11 = vld [vmem:[#allocation7 + $0x68] sm:$0xf0]  ;;  %v1236_v12 = vor.u32 %v1649_v8, %v1235_v7  ;;  %v1227_v15 = vld [vmem:[#allocation7 + $0x50] sm:$0xf] }
  0x22   :  { %276 = vmatpush.bf16.msra.mxu1 %v1244_v5  ;;  %v1633_v13 = vld [vmem:[#allocation2] sm:$0xff]  ;;  %v1240_v14 = vor.u32 %v1648_v10, %v1237_v11  ;;  %v1647_v16 = vld [vmem:[#allocation7 + $0x54] sm:$0xf0]  ;;  %v1646_v17 = vld [vmem:[#allocation7 + $0x54] sm:$0xf]  ;;  %s1154_s24 = sshll.u32 %s1962_s23, 4  ;;  %s1155_s24 = int_to_ptr.vmem [resolvable:$true] %s1154_s24 }
  0x23   :  { %290 = vmatpush.bf16.msra.mxu2 %v1248_v9  ;;  %164 = vmatpush.bf16.msra.mxu0 %v1634_v1  ;;  %v1229_v18 = vld [vmem:[#allocation7 + $0x58] sm:$0xf0]  ;;  %v1228_v19 = vor.u32 %v1647_v16, %v1227_v15  ;;  %v1219_v21 = vld [vmem:[#allocation7 + $0x40] sm:$0xf]  ;;  %v1645_v22 = vld [vmem:[#allocation7 + $0x44] sm:$0xf0] }
  0x24   :  { %v1232_v20 = vor.u32 %v1646_v17, %v1229_v18  ;;  %v1644_v23 = vld [vmem:[#allocation7 + $0x44] sm:$0xf]  ;;  %v1221_v24 = vld [vmem:[#allocation7 + $0x48] sm:$0xf0]  ;;  %v1220_v25 = vor.u32 %v1645_v22, %v1219_v21  ;;  %v1211_v27 = vld [vmem:[#allocation7 + $0x30] sm:$0xf] }
  0x25   :  { %v1224_v26 = vor.u32 %v1644_v23, %v1221_v24  ;;  %v1643_v28 = vld [vmem:[#allocation7 + $0x34] sm:$0xf0]  ;;  %v1642_v29 = vld [vmem:[#allocation7 + $0x34] sm:$0xf]  ;;  %v1213_v31 = vld [vmem:[#allocation7 + $0x38] sm:$0xf0] }
  0x26   :  { %277 = vmatpush.bf16.msra.mxu1 %v1236_v12  ;;  %1184 = vmatmul.msk.bf16.vlgmr.msra.gmra.mxu0 %vm153_vm0, %v1633_v13  ;;  %v1212_v30 = vor.u32 %v1643_v28, %v1211_v27  ;;  %v1216_v32 = vor.u32 %v1642_v29, %v1213_v31  ;;  %v1203_v33 = vld [vmem:[#allocation7 + $0x20] sm:$0xf]  ;;  %v1641_v34 = vld [vmem:[#allocation7 + $0x24] sm:$0xf0]  ;;  %v1640_v35 = vld [vmem:[#allocation7 + $0x24] sm:$0xf] }
  0x27   :  { %291 = vmatpush.bf16.msra.mxu2 %v1240_v14  ;;  %v1204_v36 = vor.u32 %v1641_v34, %v1203_v33  ;;  %v1205_v37 = vld [vmem:[#allocation7 + $0x28] sm:$0xf0]  ;;  %v1195_v39 = vld [vmem:[#allocation7 + $0x10] sm:$0xf]  ;;  %v1639_v40 = vld [vmem:[#allocation7 + $0x14] sm:$0xf0] }
  0x28   :  { %v1208_v38 = vor.u32 %v1640_v35, %v1205_v37  ;;  %v1638_v41 = vld [vmem:[#allocation7 + $0x14] sm:$0xf]  ;;  %v1196_v42 = vor.u32 %v1639_v40, %v1195_v39  ;;  %v1197_v43 = vld [vmem:[#allocation7 + $0x18] sm:$0xf0]  ;;  %v1187_v45 = vld [vmem:[#allocation7] sm:$0xf] }
  0x29   :  { %v1200_v44 = vor.u32 %v1638_v41, %v1197_v43  ;;  %v1637_v46 = vld [vmem:[#allocation7 + $0x4] sm:$0xf0]  ;;  %v1636_v47 = vld [vmem:[#allocation7 + $0x4] sm:$0xf]  ;;  %v1189_v49 = vld [vmem:[#allocation7 + $0x8] sm:$0xf0] }
  0x2a   :  { %278 = vmatpush.bf16.msra.mxu1 %v1228_v19  ;;  %v1188_v48 = vor.u32 %v1637_v46, %v1187_v45  ;;  %v1192_v50 = vor.u32 %v1636_v47, %v1189_v49  ;;  %v1363_v51 = vld [vmem:[#allocation10 + $0xe0] sm:$0xf]  ;;  %v1682_v52 = vld [vmem:[#allocation10 + $0xec] sm:$0xf0]  ;;  %v1680_v53 = vld [vmem:[#allocation10 + $0xe4] sm:$0xf] }
  0x2b   :  { %292 = vmatpush.bf16.msra.mxu2 %v1232_v20  ;;  %v1364_v54 = vor.u32 %v1682_v52, %v1363_v51  ;;  %v1365_v55 = vld [vmem:[#allocation10 + $0xf0] sm:$0xf0]  ;;  %v1347_v56 = vld [vmem:[#allocation10 + $0xc0] sm:$0xf]  ;;  %v1678_v57 = vld [vmem:[#allocation10 + $0xcc] sm:$0xf0] }
  0x2c   :  { %v1368_v58 = vor.u32 %v1680_v53, %v1365_v55  ;;  %v1676_v59 = vld [vmem:[#allocation10 + $0xc4] sm:$0xf]  ;;  %v1349_v60 = vld [vmem:[#allocation10 + $0xd0] sm:$0xf0]  ;;  %v1491_v61 = vld [vmem:[#allocation10 + $0x1e0] sm:$0xf]  ;;  %v1348_v62 = vor.u32 %v1678_v57, %v1347_v56 }
  0x2d   :  { %704 = vmatpush.bf16.msra.mxu3 %v1364_v54  ;;  %v1714_v63 = vld [vmem:[#allocation10 + $0x1ec] sm:$0xf0]  ;;  %v1712_v0 = vld [vmem:[#allocation10 + $0x1e4] sm:$0xf]  ;;  %v1493_v1 = vld [vmem:[#allocation10 + $0x1f0] sm:$0xf0]  ;;  %v1352_v2 = vor.u32 %v1676_v59, %v1349_v60 }
  0x2e   :  { %279 = vmatpush.bf16.msra.mxu1 %v1220_v25  ;;  %v1492_v3 = vor.u32 %v1714_v63, %v1491_v61  ;;  %v1496_v4 = vor.u32 %v1712_v0, %v1493_v1  ;;  %v1331_v5 = vld [vmem:[#allocation10 + $0xa0] sm:$0xf]  ;;  %v1674_v6 = vld [vmem:[#allocation10 + $0xac] sm:$0xf0]  ;;  %v1672_v7 = vld [vmem:[#allocation10 + $0xa4] sm:$0xf] }
  0x2f   :  { %293 = vmatpush.bf16.msra.mxu2 %v1224_v26  ;;  %v1333_v8 = vld [vmem:[#allocation10 + $0xb0] sm:$0xf0]  ;;  %v1475_v9 = vld [vmem:[#allocation10 + $0x1c0] sm:$0xf]  ;;  %v1710_v10 = vld [vmem:[#allocation10 + $0x1cc] sm:$0xf0]  ;;  %v1332_v14 = vor.u32 %v1674_v6, %v1331_v5 }
  0x30   :  { %718 = vmatpush.bf16.msrb.mxu0 %v1492_v3  ;;  %v1476_v11 = vor.u32 %v1710_v10, %v1475_v9  ;;  %v1708_v12 = vld [vmem:[#allocation10 + $0x1c4] sm:$0xf]  ;;  %v1477_v13 = vld [vmem:[#allocation10 + $0x1d0] sm:$0xf0]  ;;  %v1315_v16 = vld [vmem:[#allocation10 + $0x80] sm:$0xf]  ;;  %v1336_v18 = vor.u32 %v1672_v7, %v1333_v8 }
  0x31   :  { %705 = vmatpush.bf16.msra.mxu3 %v1348_v62  ;;  %v1480_v15 = vor.u32 %v1708_v12, %v1477_v13  ;;  %v1670_v17 = vld [vmem:[#allocation10 + $0x8c] sm:$0xf0]  ;;  %v1459_v19 = vld [vmem:[#allocation10 + $0x1a0] sm:$0xf]  ;;  %v1704_v21 = vld [vmem:[#allocation10 + $0x1a4] sm:$0xf] }
  0x32   :  { %280 = vmatpush.bf16.msra.mxu1 %v1212_v30  ;;  %v1706_v20 = vld [vmem:[#allocation10 + $0x1ac] sm:$0xf0]  ;;  %v1668_v22 = vld [vmem:[#allocation10 + $0x84] sm:$0xf]  ;;  %v1317_v23 = vld [vmem:[#allocation10 + $0x90] sm:$0xf0]  ;;  %v1316_v28 = vor.u32 %v1670_v17, %v1315_v16 }
  0x33   :  { %294 = vmatpush.bf16.msra.mxu2 %v1216_v32  ;;  %v1461_v24 = vld [vmem:[#allocation10 + $0x1b0] sm:$0xf0]  ;;  %v1460_v25 = vor.u32 %v1706_v20, %v1459_v19  ;;  %v1443_v27 = vld [vmem:[#allocation10 + $0x180] sm:$0xf]  ;;  %v1702_v29 = vld [vmem:[#allocation10 + $0x18c] sm:$0xf0]  ;;  %v1320_v32 = vor.u32 %v1668_v22, %v1317_v23 }
  0x34   :  { %719 = vmatpush.bf16.msrb.mxu0 %v1476_v11  ;;  %v1464_v26 = vor.u32 %v1704_v21, %v1461_v24  ;;  %v1700_v30 = vld [vmem:[#allocation10 + $0x184] sm:$0xf]  ;;  %v1445_v31 = vld [vmem:[#allocation10 + $0x190] sm:$0xf0]  ;;  %v1299_v33 = vld [vmem:[#allocation10 + $0x60] sm:$0xf]  ;;  %v1444_v37 = vor.u32 %v1702_v29, %v1443_v27 }
  0x35   :  { %706 = vmatpush.bf16.msra.mxu3 %v1332_v14  ;;  %v1666_v34 = vld [vmem:[#allocation10 + $0x6c] sm:$0xf0]  ;;  %v1664_v35 = vld [vmem:[#allocation10 + $0x64] sm:$0xf]  ;;  %v1427_v39 = vld [vmem:[#allocation10 + $0x160] sm:$0xf] }
  0x36   :  { %281 = vmatpush.bf16.msra.mxu1 %v1204_v36  ;;  %v1301_v36 = vld [vmem:[#allocation10 + $0x70] sm:$0xf0]  ;;  %v1300_v40 = vor.u32 %v1666_v34, %v1299_v33  ;;  %v1698_v41 = vld [vmem:[#allocation10 + $0x16c] sm:$0xf0]  ;;  %v1283_v45 = vld [vmem:[#allocation10 + $0x40] sm:$0xf] }
  0x37   :  { %295 = vmatpush.bf16.msra.mxu2 %v1208_v38  ;;  %v1448_v38 = vor.u32 %v1700_v30, %v1445_v31  ;;  %v1429_v43 = vld [vmem:[#allocation10 + $0x170] sm:$0xf0]  ;;  %v1662_v46 = vld [vmem:[#allocation10 + $0x4c] sm:$0xf0]  ;;  %v1411_v52 = vld [vmem:[#allocation10 + $0x140] sm:$0xf] }
  0x38   :  { %720 = vmatpush.bf16.msrb.mxu0 %v1460_v25  ;;  %v1285_v49 = vld [vmem:[#allocation10 + $0x50] sm:$0xf0]  ;;  %v1284_v53 = vor.u32 %v1662_v46, %v1283_v45  ;;  %v1694_v54 = vld [vmem:[#allocation10 + $0x14c] sm:$0xf0]  ;;  %v1692_v55 = vld [vmem:[#allocation10 + $0x144] sm:$0xf] }
  0x39   :  { %707 = vmatpush.bf16.msra.mxu3 %v1316_v28  ;;  %v1413_v56 = vld [vmem:[#allocation10 + $0x150] sm:$0xf0]  ;;  %v1766_v57 = vld [vmem:[%s2057_s2] ss:$0 sm:$0xff]  ;;  %v1267_v59 = vld [vmem:[#allocation10 + $0x20] sm:$0xf]  ;;  %v1412_v63 = vor.u32 %v1694_v54, %v1411_v52 }
  0x3a   :  { %282 = vmatpush.bf16.msra.mxu1 %v1196_v42  ;;  %v1696_v42 = vld [vmem:[#allocation10 + $0x164] sm:$0xf]  ;;  %v1658_v60 = vld [vmem:[#allocation10 + $0x2c] sm:$0xf0]  ;;  %v1269_v62 = vld [vmem:[#allocation10 + $0x30] sm:$0xf0]  ;;  %v1416_v0 = vor.u32 %v1692_v55, %v1413_v56 }
  0x3b   :  { %296 = vmatpush.bf16.msra.mxu2 %v1200_v44  ;;  %v1304_v44 = vor.u32 %v1664_v35, %v1301_v36  ;;  %v1432_v51 = vor.u32 %v1696_v42, %v1429_v43  ;;  %v1656_v61 = vld [vmem:[#allocation10 + $0x24] sm:$0xf]  ;;  %v1268_v1 = vor.u32 %v1658_v60, %v1267_v59  ;;  %v1654_v5 = vld [vmem:[#allocation10 + $0xc] sm:$0xf0]  ;;  %v1253_v9 = vld [vmem:[#allocation10 + $0x10] sm:$0xf0] }
  0x3c   :  { %721 = vmatpush.bf16.msrb.mxu0 %v1444_v37  ;;  %v1272_v3 = vor.u32 %v1656_v61, %v1269_v62  ;;  %v1652_v8 = vld [vmem:[#allocation10 + $0x4] sm:$0xf]  ;;  %v1683_v16 = vld [vmem:[#allocation10 + $0xf4] sm:$0xf0]  ;;  %v1681_v17 = vld [vmem:[#allocation10 + $0xec] sm:$0xf] }
  0x3d   :  { %708 = vmatpush.bf16.msra.mxu3 %v1300_v40  ;;  %v1256_v13 = vor.u32 %v1652_v8, %v1253_v9  ;;  %v1373_v19 = vld [vmem:[#allocation10 + $0xf8] sm:$0xf0]  ;;  %v1395_v20 = vld [vmem:[#allocation10 + $0x120] sm:$0xf]  ;;  %v1690_v21 = vld [vmem:[#allocation10 + $0x12c] sm:$0xf0] }
  0x3e   :  { %283 = vmatpush.bf16.msra.mxu1 %v1188_v48  ;;  %v1660_v48 = vld [vmem:[#allocation10 + $0x44] sm:$0xf]  ;;  %v1376_v22 = vor.u32 %v1681_v17, %v1373_v19  ;;  %v1396_v23 = vor.u32 %v1690_v21, %v1395_v20  ;;  %v1397_v25 = vld [vmem:[#allocation10 + $0x130] sm:$0xf0]  ;;  %v1355_v27 = vld [vmem:[#allocation10 + $0xc8] sm:$0xf] }
  0x3f   :  { %297 = vmatpush.bf16.msra.mxu2 %v1192_v50  ;;  %v1428_v50 = vor.u32 %v1698_v41, %v1427_v39  ;;  %v1688_v24 = vld [vmem:[#allocation10 + $0x124] sm:$0xf]  ;;  %v1679_v28 = vld [vmem:[#allocation10 + $0xd4] sm:$0xf0]  ;;  %v1677_v29 = vld [vmem:[#allocation10 + $0xcc] sm:$0xf] }
  0x40   :  { %v1356_v30 = vor.u32 %v1679_v28, %v1355_v27  ;;  %v1357_v31 = vld [vmem:[#allocation10 + $0xd8] sm:$0xf0]  ;;  %v1686_v33 = vld [vmem:[#allocation10 + $0x10c] sm:$0xf0]  ;;  %v1684_v36 = vld [vmem:[#allocation10 + $0x104] sm:$0xf] }
  0x41   :  { %722 = vmatpush.bf16.msrb.mxu0 %v1428_v50  ;;  %709 = vmatpush.bf16.msra.mxu3 %v1284_v53  ;;  %v1360_v34 = vor.u32 %v1677_v29, %v1357_v31  ;;  %v1381_v37 = vld [vmem:[#allocation10 + $0x110] sm:$0xf0]  ;;  %v1499_v39 = vld [vmem:[#allocation10 + $0x1e8] sm:$0xf]  ;;  %v1715_v40 = vld [vmem:[#allocation10 + $0x1f4] sm:$0xf0] }
  0x42   :  { %732 = vmatpush.bf16.msrb.mxu1 %v1368_v58  ;;  %v1288_v58 = vor.u32 %v1660_v48, %v1285_v49  ;;  %v1713_v41 = vld [vmem:[#allocation10 + $0x1ec] sm:$0xf]  ;;  %v1500_v42 = vor.u32 %v1715_v40, %v1499_v39  ;;  %v1501_v43 = vld [vmem:[#allocation10 + $0x1f8] sm:$0xf0]  ;;  %v1675_v45 = vld [vmem:[#allocation10 + $0xb4] sm:$0xf0] }
  0x43   :  { %746 = vmatpush.bf16.msrb.mxu2 %v1496_v4  ;;  %v1251_v4 = vld [vmem:[#allocation10] sm:$0xf]  ;;  %v1504_v46 = vor.u32 %v1713_v41, %v1501_v43  ;;  %v1673_v48 = vld [vmem:[#allocation10 + $0xac] sm:$0xf]  ;;  %v1341_v49 = vld [vmem:[#allocation10 + $0xb8] sm:$0xf0] }
  0x44   :  { %v1252_v10 = vor.u32 %v1654_v5, %v1251_v4  ;;  %v1344_v50 = vor.u32 %v1673_v48, %v1341_v49  ;;  %v1711_v52 = vld [vmem:[#allocation10 + $0x1d4] sm:$0xf0]  ;;  %v1709_v53 = vld [vmem:[#allocation10 + $0x1cc] sm:$0xf]  ;;  %v1485_v55 = vld [vmem:[#allocation10 + $0x1d8] sm:$0xf0] }
  0x45   :  { %723 = vmatpush.bf16.msrb.mxu0 %v1412_v63  ;;  %710 = vmatpush.bf16.msra.mxu3 %v1268_v1  ;;  %v1488_v56 = vor.u32 %v1709_v53, %v1485_v55  ;;  %v1669_v59 = vld [vmem:[#allocation10 + $0x8c] sm:$0xf]  ;;  %v1325_v61 = vld [vmem:[#allocation10 + $0x98] sm:$0xf0]  ;;  %v1467_v63 = vld [vmem:[#allocation10 + $0x1a8] sm:$0xf] }
  0x46   :  { %733 = vmatpush.bf16.msrb.mxu1 %v1352_v2  ;;  %v1328_v62 = vor.u32 %v1669_v59, %v1325_v61  ;;  %v1705_v1 = vld [vmem:[#allocation10 + $0x1ac] sm:$0xf]  ;;  %v1307_v5 = vld [vmem:[#allocation10 + $0x68] sm:$0xf]  ;;  %v1309_v9 = vld [vmem:[#allocation10 + $0x78] sm:$0xf0] }
  0x47   :  { %747 = vmatpush.bf16.msrb.mxu2 %v1480_v15  ;;  %v1371_v15 = vld [vmem:[#allocation10 + $0xe8] sm:$0xf]  ;;  %v1661_v19 = vld [vmem:[#allocation10 + $0x4c] sm:$0xf]  ;;  %v1293_v21 = vld [vmem:[#allocation10 + $0x58] sm:$0xf0] }
  0x48   :  { %v1291_v17 = vld [vmem:[#allocation10 + $0x48] sm:$0xf]  ;;  %v1437_v27 = vld [vmem:[#allocation10 + $0x178] sm:$0xf0]  ;;  %v1657_v31 = vld [vmem:[#allocation10 + $0x2c] sm:$0xf] }
  0x49   :  { %711 = vmatpush.bf16.msra.mxu3 %v1252_v10  ;;  %724 = vmatpush.bf16.msrb.mxu0 %v1396_v23  ;;  %v1435_v23 = vld [vmem:[#allocation10 + $0x168] sm:$0xf]  ;;  %v1421_v39 = vld [vmem:[#allocation10 + $0x158] sm:$0xf0]  ;;  %v1653_v43 = vld [vmem:[#allocation10 + $0xc] sm:$0xf] }
  0x4a   :  { %734 = vmatpush.bf16.msrb.mxu1 %v1336_v18  ;;  %v1372_v18 = vor.u32 %v1683_v16, %v1371_v15  ;;  %v1453_v15 = vld [vmem:[#allocation10 + $0x198] sm:$0xf0]  ;;  %v1275_v29 = vld [vmem:[#allocation10 + $0x28] sm:$0xf]  ;;  %v1691_v48 = vld [vmem:[#allocation10 + $0x134] sm:$0xf0] }
  0x4b   :  { %748 = vmatpush.bf16.msrb.mxu2 %v1464_v26  ;;  %v1400_v26 = vor.u32 %v1688_v24, %v1397_v25  ;;  %v1699_v24 = vld [vmem:[#allocation10 + $0x174] sm:$0xf0]  ;;  %v1697_v25 = vld [vmem:[#allocation10 + $0x16c] sm:$0xf]  ;;  %v1259_v40 = vld [vmem:[#allocation10 + $0x8] sm:$0xf] }
  0x4c   :  { %v1440_v28 = vor.u32 %v1697_v25, %v1437_v27  ;;  %v1689_v49 = vld [vmem:[#allocation10 + $0x12c] sm:$0xf]  ;;  %v1387_v53 = vld [vmem:[#allocation10 + $0x108] sm:$0xf]  ;;  %v1389_v59 = vld [vmem:[#allocation10 + $0x118] sm:$0xf0] }
  0x4d   :  { %760 = vmatpush.bf16.msrb.mxu3 %v1372_v18  ;;  %v1663_v18 = vld [vmem:[#allocation10 + $0x54] sm:$0xf0]  ;;  %v1685_v55 = vld [vmem:[#allocation10 + $0x10c] sm:$0xf]  ;;  %v1726_v27 = vld [vmem:[#allocation11 + $0x50] sm:$0xff]  ;;  %s1156_s25 = sshll.u32 %s2064_s9, 4  ;;  %s1157_s25 = int_to_ptr.hbm [resolvable:$true] %s1156_s25 }
  0x4e   :  { %735 = vmatpush.bf16.msrb.mxu1 %v1320_v32  ;;  %v1379_v32 = vld [vmem:[#allocation10 + $0x100] sm:$0xf]  ;;  %v1292_v20 = vor.u32 %v1663_v18, %v1291_v17  ;;  %v1729_v18 = vld [vmem:[#allocation11 + $0x68] sm:$0xff]  ;;  %v1747_v25 = vld [vmem:[#allocation11 + $0xf8] sm:$0xff] }
  0x4f   :  { %749 = vmatpush.bf16.msrb.mxu2 %v1448_v38  ;;  %v1380_v35 = vor.u32 %v1686_v33, %v1379_v32  ;;  %v1384_v38 = vor.u32 %v1684_v36, %v1381_v37  ;;  %v1277_v33 = vld [vmem:[#allocation10 + $0x38] sm:$0xf0]  ;;  %v1720_v17 = vld [vmem:[#allocation11 + $0x20] sm:$0xff] }
  0x50   :  { %v1280_v36 = vor.u32 %v1657_v31, %v1277_v33  ;;  %v1725_v31 = vld [vmem:[#allocation11 + $0x48] sm:$0xff] }
  0x51   :  { %761 = vmatpush.bf16.msrb.mxu3 %v1356_v30  ;;  %725 = vmatpush.bf16.msrb.mxu0 %v1380_v35  ;;  %v1659_v30 = vld [vmem:[#allocation10 + $0x34] sm:$0xf0]  ;;  %v1745_v33 = vld [vmem:[#allocation11 + $0xe8] sm:$0xff] }
  0x52   :  { %736 = vmatpush.bf16.msrb.mxu1 %v1304_v44  ;;  %v1339_v44 = vld [vmem:[#allocation10 + $0xa8] sm:$0xf]  ;;  %v1276_v32 = vor.u32 %v1659_v30, %v1275_v29  ;;  %v1695_v35 = vld [vmem:[#allocation10 + $0x154] sm:$0xf0]  ;;  %v1746_v29 = vld [vmem:[#allocation11 + $0xf0] sm:$0xff] }
  0x53   :  { %750 = vmatpush.bf16.msrb.mxu2 %v1432_v51  ;;  %v1483_v51 = vld [vmem:[#allocation10 + $0x1c8] sm:$0xf]  ;;  %v1716_v30 = vld [vmem:[#allocation11] sm:$0xff] }
  0x54   :  { %v1484_v54 = vor.u32 %v1711_v52, %v1483_v51 }
  0x55   :  { %774 = vmatpush.bf16.msra.mxu0 %v1500_v42  ;;  %v1655_v42 = vld [vmem:[#allocation10 + $0x14] sm:$0xf0] }
  0x56   :  { %737 = vmatpush.bf16.msrb.mxu1 %v1288_v58  ;;  %v1671_v58 = vld [vmem:[#allocation10 + $0x94] sm:$0xf0] }
  0x57   :  { %751 = vmatpush.bf16.msrb.mxu2 %v1416_v0  ;;  %v1707_v0 = vld [vmem:[#allocation10 + $0x1b4] sm:$0xf0] }
  0x59   :  { %775 = vmatpush.bf16.msra.mxu0 %v1484_v54  ;;  %v1687_v54 = vld [vmem:[#allocation10 + $0x114] sm:$0xf0] }
  0x5a   :  { %738 = vmatpush.bf16.msrb.mxu1 %v1272_v3  ;;  %v1469_v3 = vld [vmem:[#allocation10 + $0x1b8] sm:$0xf0] }
  0x5b   :  { %752 = vmatpush.bf16.msrb.mxu2 %v1400_v26  ;;  %v1472_v4 = vor.u32 %v1705_v1, %v1469_v3  ;;  %v1436_v26 = vor.u32 %v1699_v24, %v1435_v23  ;;  %v1727_v23 = vld [vmem:[#allocation11 + $0x58] sm:$0xff]  ;;  %v1738_v24 = vld [vmem:[#allocation11 + $0xb0] sm:$0xff] }
  0x5e   :  { %739 = vmatpush.bf16.msrb.mxu1 %v1256_v13  ;;  %v1701_v13 = vld [vmem:[#allocation10 + $0x18c] sm:$0xf] }
  0x5f   :  { %753 = vmatpush.bf16.msrb.mxu2 %v1384_v38  ;;  %v1456_v16 = vor.u32 %v1701_v13, %v1453_v15  ;;  %v1693_v38 = vld [vmem:[#allocation10 + $0x14c] sm:$0xf]  ;;  %v1731_v13 = vld [vmem:[#allocation11 + $0x78] sm:$0xff] }
  0x60   :  { %v1424_v41 = vor.u32 %v1693_v38, %v1421_v39  ;;  %v1721_v15 = vld [vmem:[#allocation11 + $0x28] sm:$0xff]  ;;  %v1743_v38 = vld [vmem:[#allocation11 + $0xd8] sm:$0xff] }
  0x61   :  { %v1733_v39 = vld [vmem:[#allocation11 + $0x88] sm:$0xff] }
  0xa3   :  { %v166_v47 = vpop.f32.mrf.mxu0 }
  0xa4   :  { %v167_v2 = vadd.f32 %v1766_v57, %v166_v47  ;;  %v1340_v47 = vor.u32 %v1675_v45, %v1339_v44  ;;  %v1261_v44 = vld [vmem:[#allocation10 + $0x18] sm:$0xf0]  ;;  %v1260_v45 = vor.u32 %v1655_v42, %v1259_v40  ;;  %v1742_v40 = vld [vmem:[#allocation11 + $0xd0] sm:$0xff]  ;;  %v1732_v42 = vld [vmem:[#allocation11 + $0x80] sm:$0xff] }
  0xa6   :  { %v171_v11 = vmax.f32 %v167_v2, 0.0  ;;  %762 = vmatpush.bf16.msrb.mxu3 %v1340_v47  ;;  %v1468_v2 = vor.u32 %v1707_v0, %v1467_v63  ;;  %v1403_v47 = vld [vmem:[#allocation10 + $0x128] sm:$0xf] }
  0xa7   :  { %v1404_v51 = vor.u32 %v1691_v48, %v1403_v47  ;;  %v1740_v47 = vld [vmem:[#allocation11 + $0xc0] sm:$0xff] }
  0xa8   :  { %776 = vmatpush.bf16.msra.mxu0 %v1468_v2 }
  0xab   :  { %v168_v6 = vpop.f32.mrf.mxu0 }
  0xac   :  { %v169_v7 = vadd.f32 %v1766_v57, %v168_v6  ;;  %v1323_v57 = vld [vmem:[#allocation10 + $0x88] sm:$0xf]  ;;  %v1667_v6 = vld [vmem:[#allocation10 + $0x74] sm:$0xf0] }
  0xad   :  { %v1324_v60 = vor.u32 %v1671_v58, %v1323_v57  ;;  %v1308_v8 = vor.u32 %v1667_v6, %v1307_v5  ;;  %v1388_v58 = vor.u32 %v1687_v54, %v1387_v53  ;;  %v1723_v5 = vld [vmem:[#allocation11 + $0x38] sm:$0xff] }
  0xae   :  { %v172_v12 = vmax.f32 %v169_v7, 0.0  ;;  %v1665_v7 = vld [vmem:[#allocation10 + $0x6c] sm:$0xf] }
  0xaf   :  { %763 = vmatpush.bf16.msrb.mxu3 %v1324_v60  ;;  %v1312_v10 = vor.u32 %v1665_v7, %v1309_v9  ;;  %v1392_v60 = vor.u32 %v1685_v55, %v1389_v59 }
  0xb0   :  { %v173_v14 = vpack.c.bf16 %v172_v12, %v171_v11  ;;  %v1451_v11 = vld [vmem:[#allocation10 + $0x188] sm:$0xf]  ;;  %v1703_v12 = vld [vmem:[#allocation10 + $0x194] sm:$0xf0] }
  0xb2   :  { %284 = vmatmul.bf16.vlgmr.msra.gmra.mxu1 %v173_v14  ;;  %298 = vmatmul.bf16.vlgmr.msra.gmra.mxu2 %v173_v14  ;;  %v1452_v14 = vor.u32 %v1703_v12, %v1451_v11 }
  0xb3   :  { %788 = vmatpush.bf16.msra.mxu1 %v1376_v22  ;;  %802 = vmatpush.bf16.msra.mxu2 %v1504_v46  ;;  %v1296_v22 = vor.u32 %v1661_v19, %v1293_v21  ;;  %v1264_v46 = vor.u32 %v1653_v43, %v1261_v44  ;;  %v1719_v19 = vld [vmem:[#allocation11 + $0x18] sm:$0xff]  ;;  %v1741_v43 = vld [vmem:[#allocation11 + $0xc8] sm:$0xff] }
  0xb4   :  { %764 = vmatpush.bf16.msrb.mxu3 %v1308_v8  ;;  %777 = vmatpush.bf16.msra.mxu0 %v1452_v14  ;;  %v1739_v21 = vld [vmem:[#allocation11 + $0xb8] sm:$0xff]  ;;  %v374_v44 = vld [vmem:[%s2061_s6] sm:$0xf] }
  0xb5   :  { %v376_v48 = vperm.slane %v374_v44, 0 }
  0xb7   :  { %789 = vmatpush.bf16.msra.mxu1 %v1360_v34  ;;  %803 = vmatpush.bf16.msra.mxu2 %v1488_v56  ;;  %v1419_v34 = vld [vmem:[#allocation10 + $0x148] sm:$0xf]  ;;  %v190_v56 = vld [vmem:[#allocation8] sm:$0x3] }
  0xb8   :  { %765 = vmatpush.bf16.msrb.mxu3 %v1292_v20  ;;  %778 = vmatpush.bf16.msra.mxu0 %v1436_v26  ;;  %v1420_v37 = vor.u32 %v1695_v35, %v1419_v34  ;;  %v192_v61 = vperm.slane %v190_v56, 0  ;;  %v193_v1 = vperm.slane %v190_v56, 1  ;;  %v1728_v20 = vld [vmem:[#allocation11 + $0x60] sm:$0xff]  ;;  %v1717_v26 = vld [vmem:[#allocation11 + $0x8] sm:$0xff]  ;;  %v1735_v35 = vld [vmem:[#allocation11 + $0x98] sm:$0xff] }
  0xb9   :  { %v1724_v34 = vld [vmem:[#allocation11 + $0x40] sm:$0xff] }
  0xbb   :  { %790 = vmatpush.bf16.msra.mxu1 %v1344_v50  ;;  %804 = vmatpush.bf16.msra.mxu2 %v1472_v4  ;;  %v1405_v50 = vld [vmem:[#allocation10 + $0x138] sm:$0xf0] }
  0xbc   :  { %766 = vmatpush.bf16.msrb.mxu3 %v1276_v32  ;;  %779 = vmatpush.bf16.msra.mxu0 %v1420_v37  ;;  %v1408_v52 = vor.u32 %v1689_v49, %v1405_v50  ;;  %v1736_v32 = vld [vmem:[#allocation11 + $0xa0] sm:$0xff]  ;;  %v1734_v37 = vld [vmem:[#allocation11 + $0x90] sm:$0xff] }
  0xbf   :  { %791 = vmatpush.bf16.msra.mxu1 %v1328_v62  ;;  %805 = vmatpush.bf16.msra.mxu2 %v1456_v16  ;;  %v1730_v16 = vld [vmem:[#allocation11 + $0x70] sm:$0xff] }
  0xc0   :  { %767 = vmatpush.bf16.msrb.mxu3 %v1260_v45  ;;  %780 = vmatpush.bf16.msra.mxu0 %v1404_v51 }
  0xc3   :  { %792 = vmatpush.bf16.msra.mxu1 %v1312_v10  ;;  %806 = vmatpush.bf16.msra.mxu2 %v1440_v28  ;;  %v1722_v10 = vld [vmem:[#allocation11 + $0x30] sm:$0xff]  ;;  %v1737_v28 = vld [vmem:[#allocation11 + $0xa8] sm:$0xff] }
  0xc4   :  { %781 = vmatpush.bf16.msra.mxu0 %v1388_v58 }
  0xc7   :  { %793 = vmatpush.bf16.msra.mxu1 %v1296_v22  ;;  %807 = vmatpush.bf16.msra.mxu2 %v1424_v41  ;;  %v1718_v22 = vld [vmem:[#allocation11 + $0x10] sm:$0xff] }
  0xcb   :  { %794 = vmatpush.bf16.msra.mxu1 %v1280_v36  ;;  %808 = vmatpush.bf16.msra.mxu2 %v1408_v52  ;;  %v1744_v36 = vld [vmem:[#allocation11 + $0xe0] sm:$0xff]  ;;  %v377_v52 = vperm.slane %v374_v44, 1 }
  0xcf   :  { %795 = vmatpush.bf16.msra.mxu1 %v1264_v46  ;;  %809 = vmatpush.bf16.msra.mxu2 %v1392_v60 }
 0x12f   :  { %v285_v57 = vpop.f32.mrf.mxu1 }
 0x130   :  { %v286_v63 = vadd.f32 %v285_v57, %v192_v61 }
 0x132   :  { %v304_v3 = vmax.f32 %v286_v63, 0.0 }
 0x135   :  { %v299_v62 = vpop.f32.mrf.mxu2 }
 0x136   :  { %v300_v6 = vadd.f32 %v299_v62, %v193_v1 }
 0x137   :  { %v287_v0 = vpop.f32.mrf.mxu1 }
 0x138   :  { %v288_v2 = vadd.f32 %v287_v0, %v192_v61  ;;  %v305_v11 = vmax.f32 %v300_v6, 0.0 }
 0x13a   :  { %v306_v4 = vmax.f32 %v288_v2, 0.0 }
 0x13c   :  { %v308_v7 = vpack.c.bf16 %v306_v4, %v304_v3 }
 0x13d   :  { %v301_v8 = vpop.f32.mrf.mxu2 }
 0x13e   :  { %v302_v9 = vadd.f32 %v301_v8, %v193_v1  ;;  %712 = vmatmul.bf16.vlgmr.msra.gmra.mxu3 %v308_v7  ;;  %740 = vmatmul.bf16.vlgmr.msrb.gmra.mxu1 %v308_v7 }
 0x13f   :  { %1088 = vmatpush.bf16.msra.mxu3 %v1723_v5  ;;  %1116 = vmatpush.bf16.msrb.mxu1 %v1739_v21 }
 0x140   :  { %v307_v12 = vmax.f32 %v302_v9, 0.0 }
 0x142   :  { %v309_v14 = vpack.c.bf16 %v307_v12, %v305_v11  ;;  %v379_v11 = vperm.slane %v374_v44, 3 }
 0x143   :  { %1089 = vmatpush.bf16.msra.mxu3 %v1722_v10  ;;  %1117 = vmatpush.bf16.msrb.mxu1 %v1738_v24 }
 0x144   :  { %726 = vmatmul.bf16.vlgmr.msrb.gmra.mxu0 %v309_v14  ;;  %754 = vmatmul.bf16.vlgmr.msrb.gmra.mxu2 %v309_v14 }
 0x145   :  { %1102 = vmatpush.bf16.msrb.mxu0 %v1731_v13  ;;  %1130 = vmatpush.bf16.msrb.mxu2 %v1747_v25 }
 0x147   :  { %1090 = vmatpush.bf16.msra.mxu3 %v1721_v15  ;;  %1118 = vmatpush.bf16.msrb.mxu1 %v1737_v28 }
 0x149   :  { %1103 = vmatpush.bf16.msrb.mxu0 %v1730_v16  ;;  %1131 = vmatpush.bf16.msrb.mxu2 %v1746_v29 }
 0x14b   :  { %1091 = vmatpush.bf16.msra.mxu3 %v1720_v17  ;;  %1119 = vmatpush.bf16.msrb.mxu1 %v1736_v32 }
 0x14d   :  { %1104 = vmatpush.bf16.msrb.mxu0 %v1729_v18  ;;  %1132 = vmatpush.bf16.msrb.mxu2 %v1745_v33 }
 0x14e   :  { %768 = vmatmul.bf16.vlgmr.msrb.gmra.mxu3 %v308_v7  ;;  %796 = vmatmul.bf16.vlgmr.msra.gmra.mxu1 %v308_v7  ;;  %v378_v7 = vperm.slane %v374_v44, 2 }
 0x14f   :  { %1092 = vmatpush.bf16.msra.mxu3 %v1719_v19  ;;  %1120 = vmatpush.bf16.msrb.mxu1 %v1735_v35 }
 0x151   :  { %1105 = vmatpush.bf16.msrb.mxu0 %v1728_v20  ;;  %1133 = vmatpush.bf16.msrb.mxu2 %v1744_v36 }
 0x153   :  { %1093 = vmatpush.bf16.msra.mxu3 %v1718_v22  ;;  %1121 = vmatpush.bf16.msrb.mxu1 %v1734_v37 }
 0x154   :  { %782 = vmatmul.bf16.vlgmr.msra.gmra.mxu0 %v309_v14  ;;  %810 = vmatmul.bf16.vlgmr.msra.gmra.mxu2 %v309_v14 }
 0x155   :  { %1106 = vmatpush.bf16.msrb.mxu0 %v1727_v23  ;;  %1134 = vmatpush.bf16.msrb.mxu2 %v1743_v38 }
 0x157   :  { %1094 = vmatpush.bf16.msra.mxu3 %v1717_v26  ;;  %1122 = vmatpush.bf16.msrb.mxu1 %v1733_v39 }
 0x159   :  { %1107 = vmatpush.bf16.msrb.mxu0 %v1726_v27  ;;  %1135 = vmatpush.bf16.msrb.mxu2 %v1742_v40 }
 0x15b   :  { %1095 = vmatpush.bf16.msra.mxu3 %v1716_v30  ;;  %1123 = vmatpush.bf16.msrb.mxu1 %v1732_v42 }
 0x15d   :  { %1108 = vmatpush.bf16.msrb.mxu0 %v1725_v31  ;;  %1136 = vmatpush.bf16.msrb.mxu2 %v1741_v43  ;;  %v1767_v31 = vld [vmem:[%s2063_s8] ss:$0 sm:$0xff] }
 0x161   :  { %1109 = vmatpush.bf16.msrb.mxu0 %v1724_v34  ;;  %1137 = vmatpush.bf16.msrb.mxu2 %v1740_v47 }
 0x1bb   :  { %v741_v41 = vpop.f32.mrf.mxu1 }
 0x1bc   :  { %v742_v57 = vadd.f32 %v741_v41, %v377_v52 }
 0x1c1   :  { %v713_v45 = vpop.f32.mrf.mxu3  ;;  %v727_v46 = vpop.f32.mrf.mxu0 }
 0x1c2   :  { %v714_v49 = vadd.f32 %v713_v45, %v376_v48 }
 0x1c3   :  { %v743_v50 = vpop.f32.mrf.mxu1 }
 0x1c4   :  { %v728_v55 = vadd.f32 %v727_v46, %v714_v49  ;;  %v744_v60 = vadd.f32 %v743_v50, %v377_v52 }
 0x1c6   :  { %v816_v59 = vmax.f32 %v728_v55, 0.0 }
 0x1c7   :  { %v755_v51 = vpop.f32.mrf.mxu2 }
 0x1c8   :  { %v756_v61 = vadd.f32 %v755_v51, %v742_v57 }
 0x1c9   :  { %v715_v53 = vpop.f32.mrf.mxu3  ;;  %v729_v54 = vpop.f32.mrf.mxu0 }
 0x1ca   :  { %v716_v56 = vadd.f32 %v715_v53, %v376_v48  ;;  %v817_v5 = vmax.f32 %v756_v61, 0.0 }
 0x1cb   :  { %v797_v1 = vpop.f32.mrf.mxu1 }
 0x1cc   :  { %v730_v58 = vadd.f32 %v729_v54, %v716_v56  ;;  %v798_v17 = vadd.f32 %v797_v1, %v379_v11 }
 0x1ce   :  { %v820_v62 = vmax.f32 %v730_v58, 0.0 }
 0x1cf   :  { %v757_v63 = vpop.f32.mrf.mxu2 }
 0x1d0   :  { %v824_v0 = vpack.c.bf16 %v820_v62, %v816_v59  ;;  %v758_v2 = vadd.f32 %v757_v63, %v744_v60 }
 0x1d1   :  { %v769_v3 = vpop.f32.mrf.mxu3  ;;  %v783_v4 = vpop.f32.mrf.mxu0 }
 0x1d2   :  { %v821_v6 = vmax.f32 %v758_v2, 0.0  ;;  %1096 = vmatmul.bf16.vlgmr.msra.gmra.mxu3 %v824_v0  ;;  %v770_v9 = vadd.f32 %v769_v3, %v378_v7 }
 0x1d3   :  { %v799_v15 = vpop.f32.mrf.mxu1 }
 0x1d4   :  { %v825_v8 = vpack.c.bf16 %v821_v6, %v817_v5  ;;  %v784_v13 = vadd.f32 %v783_v4, %v770_v9  ;;  %v800_v20 = vadd.f32 %v799_v15, %v379_v11 }
 0x1d6   :  { %1110 = vmatmul.bf16.vlgmr.msrb.gmra.mxu0 %v825_v8  ;;  %v818_v19 = vmax.f32 %v784_v13, 0.0 }
 0x1d7   :  { %v811_v10 = vpop.f32.mrf.mxu2 }
 0x1d8   :  { %v812_v21 = vadd.f32 %v811_v10, %v798_v17 }
 0x1d9   :  { %v771_v12 = vpop.f32.mrf.mxu3  ;;  %v785_v16 = vpop.f32.mrf.mxu0 }
 0x1da   :  { %v772_v14 = vadd.f32 %v771_v12, %v378_v7  ;;  %v819_v26 = vmax.f32 %v812_v21, 0.0 }
 0x1dc   :  { %v786_v18 = vadd.f32 %v785_v16, %v772_v14 }
 0x1de   :  { %v822_v22 = vmax.f32 %v786_v18, 0.0 }
 0x1df   :  { %v813_v23 = vpop.f32.mrf.mxu2 }
 0x1e0   :  { %v826_v24 = vpack.c.bf16 %v822_v22, %v818_v19  ;;  %v814_v25 = vadd.f32 %v813_v23, %v800_v20 }
 0x1e2   :  { %v823_v27 = vmax.f32 %v814_v25, 0.0  ;;  %1124 = vmatmul.bf16.vlgmr.msrb.gmra.mxu1 %v826_v24 }
 0x1e4   :  { %v827_v28 = vpack.c.bf16 %v823_v27, %v819_v26 }
 0x1e6   :  { %1138 = vmatmul.bf16.vlgmr.msrb.gmra.mxu2 %v827_v28 }
 0x253   :  { %v1111_v30 = vpop.f32.mrf.mxu0 }
 0x255   :  { %v1097_v29 = vpop.f32.mrf.mxu3 }
 0x256   :  { %v1098_v33 = vadd.f32 %v1767_v31, %v1097_v29 }
 0x258   :  { %v1112_v37 = vadd.f32 %v1111_v30, %v1098_v33 }
 0x25b   :  { %v1113_v38 = vpop.f32.mrf.mxu0 }
 0x25d   :  { %v1099_v34 = vpop.f32.mrf.mxu3 }
 0x25e   :  { %v1100_v36 = vadd.f32 %v1767_v31, %v1099_v34 }
 0x25f   :  { %v1125_v32 = vpop.f32.mrf.mxu1 }
 0x260   :  { %v1126_v39 = vadd.f32 %v1125_v32, %v1112_v37  ;;  %v1114_v41 = vadd.f32 %v1113_v38, %v1100_v36 }
 0x267   :  { %v1127_v40 = vpop.f32.mrf.mxu1 }
 0x268   :  { %v1128_v43 = vadd.f32 %v1127_v40, %v1114_v41 }
 0x269   :  { %v1139_v35 = vpop.f32.mrf.mxu2 }
 0x26a   :  { %v1140_v42 = vadd.f32 %v1139_v35, %v1126_v39 }
 0x26c   :  { %1768 = vtanh.f32 %v1140_v42 }
 0x271   :  { %v1141_v44 = vpop.f32.mrf.mxu2 }
 0x272   :  { %v1142_v45 = vadd.f32 %v1141_v44, %v1128_v43  ;;  %v1769_v46 = vpop.eup %1768 }
 0x274   :  { %1770 = vtanh.f32 %v1142_v45 }
 0x27a   :  { %v1771_v47 = vpop.eup %1770 }
 0x27b   :  { %v1751_v48 = vpack.c.bf16 %v1771_v47, %v1769_v46 }
 0x27d   :  { %1752 = vst [vmem:[#allocation13] sm:$0xff] %v1751_v48  }
 0x27e   :  { %1162 = dma.vmem_to_hbm [thread:$0]  %s1155_s24, 128, %s1157_s25, [#allocation4], %s1951_s17, %s1951_s17, %s1952_s18  }
 0x27f   :  { %1948 = dma.done.wait [#allocation4], 128  }
 0x280   :  { %1949 = vsyncadd [#allocation4], 4294967168 }
 0x281   :  { %1167 = vsyncpa [#allocation3], 1 }
 0x282   :  { %1168 = vsyncpa [#allocation6], 1 }
 0x283   :  { %1169 = vsyncpa [#allocation9], 1 }
 0x284   :  { %1170 = vsyncpa [#allocation12], 1 }
 0x285   :  { %1171 = vsyncpa [#allocation4], 1 }

</bundles_post_ra>
